<compile_context>
chip_gen: v7x
topology: tpu7x:2x2x1
jax: 0.10.0
libtpu: 0.0.40
codegen_flags: <defaults>
</compile_context>

<pallas_src>
import math
import functools

import jax
import jax.numpy as jnp
from jax.experimental import pallas as pl
from jax.experimental.pallas import tpu as pltpu

# ---- model hyper-parameters (small, consistent with the module) -------------
D_MODEL = 32
N_HEADS = 4
KV_HEADS = 2
D_HEAD = D_MODEL // N_HEADS          # 8
D_KV = D_HEAD * KV_HEADS             # 16
BATCH = 2
SEQ = 8
RMS_EPS = float(jnp.finfo(jnp.float32).eps)   # torch.nn.RMSNorm default eps
SCALE = float(math.sqrt(D_HEAD))              # register_buffer 'scale'
NEG_INF = -1e30                               # finite mask value (diag always kept)


def _attention_kernel(x_ref, wqkv_ref, wo_ref, g_ref, csq_ref, csk_ref, bias_ref,
                      out_ref, *, batch, seq, d_model, n_heads, kv_heads, d_head,
                      eps, compute_dtype):
    cd = compute_dtype
    B, N, a, kvh = batch, seq, d_head, kv_heads
    reps = n_heads // kv_heads
    d_kv = kvh * a

    x = x_ref[...]                                            # (B*N, D) f32

    # --- RMSNorm (f32 VPU) ----------------------------------------------------
    ms = jnp.mean(x * x, axis=-1, keepdims=True)              # (B*N, 1)
    x_norm = x * jax.lax.rsqrt(ms + eps) * g_ref[...]         # (B*N, D)

    # --- fused QKV projection: ONE MXU matmul, f32 accumulation ---------------
    # w_q's output columns are pre-permuted wrapper-side to kv-group-major
    # (j, r, a) ordering, so the query-grouped split below is a pure reshape.
    qkv = jnp.dot(x_norm.astype(cd), wqkv_ref[...],
                  preferred_element_type=jnp.float32)         # (B*N, D + 2*Dkv)
    q = qkv[:, :d_model]                                      # (B*N, D)  (j,r,a) cols
    k = qkv[:, d_model:d_model + d_kv]                        # (B*N, Dkv)
    v = qkv[:, d_model + d_kv:]                               # (B*N, Dkv)

    # --- query-grouped GQA layout (no K/V duplication) -------------------------
    # q -> (B*kvh, reps*N, a) : group g = (b, kv-head j), query row = (r, n)
    qg = jnp.transpose(q.reshape(B, N, kvh * reps, a), (0, 2, 1, 3))   # (B, kvh*reps, N, a)
    qg = qg * csq_ref[...]                    # rope factor (+1/scale folded), (N,a) bcast
    qg = qg.reshape(B * kvh, reps * N, a)

    kg = jnp.transpose(k.reshape(B, N, kvh, a), (0, 2, 1, 3))          # (B, kvh, N, a)
    kg = kg * csk_ref[...]                    # rope factor, (N,a) broadcast
    kg = kg.reshape(B * kvh, N, a)
    vg = jnp.transpose(v.reshape(B, N, kvh, a), (0, 2, 1, 3)).reshape(B * kvh, N, a)

    # --- batched attention over B*kvh groups ----------------------------------
    scores = jnp.einsum('gqa,gka->gqk', qg.astype(cd), kg.astype(cd),
                        preferred_element_type=jnp.float32)   # (B*kvh, reps*N, N)
    scores = scores + bias_ref[...]                           # additive causal bias

    m = jnp.max(scores, axis=-1, keepdims=True)
    e = jnp.exp(scores - m)                                   # EUP
    denom = jnp.sum(e, axis=-1, keepdims=True)
    approx = jnp.dtype(cd) != jnp.dtype(jnp.float32)
    probs = e * pl.reciprocal(denom, approx=approx)

    sg = jnp.einsum('gqk,gka->gqa', probs.astype(cd), vg.astype(cd),
                    preferred_element_type=jnp.float32)       # (B*kvh, reps*N, a)

    # back to (B*N, D) with kv-group-major (j, r, a) columns; w_o's rows were
    # permuted wrapper-side to match, so no extra relayout is needed.
    s = jnp.transpose(sg.reshape(B, kvh * reps, N, a), (0, 2, 1, 3)).reshape(B * N, d_model)

    # --- output projection + residual ------------------------------------------
    o = jnp.dot(s.astype(cd), wo_ref[...], preferred_element_type=jnp.float32)

    # --- single lane-dense fused store: [ residual-out | k | v ] ---------------
    out_ref[...] = jnp.concatenate([x + o, qkv[:, d_model:]], axis=1)


def transformer_attention(x, wq, wk, wv, wo, g, cos, sin, *,
                          compute_dtype=jnp.float32):
    """x: (B, N, D).  Returns (x + attn_out, kv_cache[2, B, N, Dkv])."""
    B, N, D = x.shape
    dkv = wk.shape[1]
    reps = N_HEADS // KV_HEADS
    a = D_HEAD

    # ---- one-time layout prep (at scale this is done once at weight load) ----
    # Permute w_q output columns and w_o input rows from head-major (r, j, a)
    # ordering to kv-group-major (j, r, a): query-grouped GQA with no 5-D
    # transposes and no K/V duplication inside the kernel.
    wq_g = wq.reshape(D, reps, KV_HEADS, a).transpose(0, 2, 1, 3).reshape(D, D)
    wo_g = wo.reshape(reps, KV_HEADS, a, D).transpose(1, 0, 2, 3).reshape(D, D)
    w_qkv = jnp.concatenate([wq_g, wk, wv], axis=1).astype(compute_dtype)
    wo_g = wo_g.astype(compute_dtype)

    # small rope tables only (N, d_head); broadcast happens inside the kernel.
    cs_q = ((cos + sin) / SCALE).astype(jnp.float32)          # 1/scale folded in
    cs_k = (cos + sin).astype(jnp.float32)

    # additive causal bias, tiled over the reps query groups: (reps*N, N)
    idx = jnp.arange(N)
    bias_nn = jnp.where(idx[:, None] >= idx[None, :], 0.0, NEG_INF).astype(jnp.float32)
    bias = jnp.tile(bias_nn, (reps, 1))

    x2 = x.reshape(B * N, D)

    kernel = functools.partial(
        _attention_kernel,
        batch=B, seq=N, d_model=D, n_heads=N_HEADS, kv_heads=KV_HEADS,
        d_head=a, eps=RMS_EPS, compute_dtype=compute_dtype)

    vmem = pl.BlockSpec(memory_space=pltpu.MemorySpace.VMEM)
    fused = pl.pallas_call(
        kernel,
        out_shape=jax.ShapeDtypeStruct((B * N, D + 2 * dkv), jnp.float32),
        in_specs=[vmem] * 7,
        out_specs=vmem,
    )(x2, w_qkv, wo_g, g, cs_q, cs_k, bias)

    out = fused[:, :D].reshape(B, N, D)
    k_out = fused[:, D:D + dkv].reshape(B, N, dkv)
    v_out = fused[:, D + dkv:].reshape(B, N, dkv)
    kv_cache = jnp.stack([k_out, v_out])
    return out, kv_cache


# ---- rotary-like buffers, exactly as in __init__ -----------------------------
def make_cos_sin(n, d_head):
    exponent = -2.0 * (jnp.arange(d_head) // 2).astype(jnp.float32) / d_head
    theta = jnp.power(10000.0, exponent)                      # (d_head,)
    pos = jnp.arange(n, dtype=jnp.float32)
    ang = jnp.outer(pos, theta)                                # (n, d_head)
    cos = jnp.cos(ang)
    sin = jnp.sin(ang)
    sign = jnp.where(jnp.arange(n) % 2 == 0, -1.0, 1.0)[:, None]   # sin[0::2] *= -1
    sin = sin * sign
    return cos, sin


# ---- pure-JAX reference (for verification) -----------------------------------
def reference_forward(x, wq, wk, wv, wo, g, cos, sin):
    B, N, D = x.shape
    x_norm = x * jax.lax.rsqrt(jnp.mean(x * x, -1, keepdims=True) + RMS_EPS) * g
    q = x_norm @ wq
    k = x_norm @ wk
    v = x_norm @ wv
    kv_cache = jnp.stack([k, v])
    qh = q.reshape(B, N, N_HEADS, D_HEAD).transpose(0, 2, 1, 3)
    kh = k.reshape(B, N, KV_HEADS, D_HEAD).transpose(0, 2, 1, 3)
    vh = v.reshape(B, N, KV_HEADS, D_HEAD).transpose(0, 2, 1, 3)
    qh = qh * cos + qh * sin
    kh = kh * cos + kh * sin
    reps = N_HEADS // KV_HEADS
    kh = jnp.tile(kh, (1, reps, 1, 1))
    vh = jnp.tile(vh, (1, reps, 1, 1))
    scores = (qh @ kh.transpose(0, 1, 3, 2)) / SCALE
    mask = jnp.tril(jnp.ones((N, N), bool))
    scores = jnp.where(mask, scores, -jnp.inf)
    s = jax.nn.softmax(scores, -1) @ vh
    s = s.transpose(0, 2, 1, 3).reshape(B, N, D)
    return x + s @ wo, kv_cache


if __name__ == "__main__":
    key = jax.random.PRNGKey(0)
    kx, kq, kk, kv_, ko = jax.random.split(key, 5)

    x = jax.random.normal(kx, (BATCH, SEQ, D_MODEL), dtype=jnp.float32)
    # weights stored pre-transposed (in_dim, out_dim) so kernel does x @ W
    wq = jax.random.normal(kq, (D_MODEL, D_MODEL), dtype=jnp.float32) * 0.05
    wk = jax.random.normal(kk, (D_MODEL, D_KV), dtype=jnp.float32) * 0.05
    wv = jax.random.normal(kv_, (D_MODEL, D_KV), dtype=jnp.float32) * 0.05
    wo = jax.random.normal(ko, (D_MODEL, D_MODEL), dtype=jnp.float32) * 0.05
    g = jnp.ones((1, D_MODEL), dtype=jnp.float32)              # RMSNorm weight init

    cos, sin = make_cos_sin(SEQ, D_HEAD)
    ref_out, ref_kv = reference_forward(x, wq, wk, wv, wo, g, cos, sin)

    # f32 MXU-operand path (strict numerics; v5e-style)
    out, kv_cache = transformer_attention(x, wq, wk, wv, wo, g, cos, sin,
                                          compute_dtype=jnp.float32)
    out = jax.block_until_ready(out)
    kv_cache = jax.block_until_ready(kv_cache)
    assert out.shape == (BATCH, SEQ, D_MODEL)
    assert kv_cache.shape == (2, BATCH, SEQ, D_KV)
    assert jnp.allclose(out, ref_out, atol=1e-5, rtol=1e-5)
    assert jnp.allclose(kv_cache, ref_kv, atol=1e-5, rtol=1e-5)

    # bf16 MXU-operand path (v6e/v7x fast path; f32 accumulation + elementwise)
    out_bf, kv_bf = transformer_attention(x, wq, wk, wv, wo, g, cos, sin,
                                          compute_dtype=jnp.bfloat16)
    out_bf = jax.block_until_ready(out_bf)
    kv_bf = jax.block_until_ready(kv_bf)
    assert jnp.allclose(out_bf, ref_out, atol=3e-2, rtol=3e-2)
    assert jnp.allclose(kv_bf, ref_kv, atol=3e-2, rtol=3e-2)

    print("KERNEL_OK")
</pallas_src>

<mosaic_0001>
module attributes {stable_mosaic.version = 11 : i64} {
  func.func @_attention_kernel(%arg0: memref<16x32xf32, #tpu.memory_space<vmem>>, %arg1: memref<32x64xf32, #tpu.memory_space<vmem>>, %arg2: memref<32x32xf32, #tpu.memory_space<vmem>>, %arg3: memref<1x32xf32, #tpu.memory_space<vmem>>, %arg4: memref<8x8xf32, #tpu.memory_space<vmem>>, %arg5: memref<8x8xf32, #tpu.memory_space<vmem>>, %arg6: memref<16x8xf32, #tpu.memory_space<vmem>>, %arg7: memref<16x64xf32, #tpu.memory_space<vmem>>) attributes {dimension_semantics = [], scalar_prefetch = 0 : i64, scratch_operands = 0 : i64, tpu.core_type = #tpu.core_type<tc>} {
    %c0 = arith.constant 0 : index
    %c0_0 = arith.constant 0 : index
    %0 = vector.load %arg0[%c0, %c0_0] : memref<16x32xf32, #tpu.memory_space<vmem>>, vector<16x32xf32>
    %1 = arith.mulf %0, %0 : vector<16x32xf32>
    %cst = arith.constant dense<0.000000e+00> : vector<16xf32>
    %2 = vector.multi_reduction <add>, %1, %cst [1] : vector<16x32xf32> to vector<16xf32>
    %3 = vector.shape_cast %2 : vector<16xf32> to vector<16x1xf32>
    %cst_1 = arith.constant 3.200000e+01 : f32
    %4 = vector.broadcast %cst_1 : f32 to vector<16x1xf32>
    %5 = arith.divf %3, %4 : vector<16x1xf32>
    %cst_2 = arith.constant 1.1920929E-7 : f32
    %6 = vector.broadcast %cst_2 : f32 to vector<16x1xf32>
    %7 = arith.addf %5, %6 : vector<16x1xf32>
    %8 = math.rsqrt %7 : vector<16x1xf32>
    %9 = vector.broadcast %8 : vector<16x1xf32> to vector<16x32xf32>
    %10 = arith.mulf %0, %9 : vector<16x32xf32>
    %c0_3 = arith.constant 0 : index
    %c0_4 = arith.constant 0 : index
    %11 = vector.load %arg3[%c0_3, %c0_4] : memref<1x32xf32, #tpu.memory_space<vmem>>, vector<1x32xf32>
    %12 = vector.broadcast %11 : vector<1x32xf32> to vector<16x32xf32>
    %13 = arith.mulf %10, %12 : vector<16x32xf32>
    %c0_5 = arith.constant 0 : index
    %c0_6 = arith.constant 0 : index
    %14 = vector.load %arg1[%c0_5, %c0_6] : memref<32x64xf32, #tpu.memory_space<vmem>>, vector<32x64xf32>
    %cst_7 = arith.constant dense<0.000000e+00> : vector<16x64xf32>
    %15 = tpu.matmul %13, %14, %cst_7 {dimension_numbers = #tpu.dot_dimension_numbers<[1], [0], [0], [1], [0, 0, 1, 1], [], []>} : vector<16x32xf32>, vector<32x64xf32>, vector<16x64xf32> -> vector<16x64xf32>
    %16 = vector.extract_strided_slice %15 {offsets = [0, 0], sizes = [16, 32], strides = [1, 1]} : vector<16x64xf32> to vector<16x32xf32>
    %17 = vector.extract_strided_slice %15 {offsets = [0, 32], sizes = [16, 16], strides = [1, 1]} : vector<16x64xf32> to vector<16x16xf32>
    %18 = vector.extract_strided_slice %15 {offsets = [0, 48], sizes = [16, 16], strides = [1, 1]} : vector<16x64xf32> to vector<16x16xf32>
    %19 = vector.shape_cast %16 : vector<16x32xf32> to vector<2x8x4x8xf32>
    %20 = tpu.transpose %19, [0, 2, 1, 3] : vector<2x8x4x8xf32> -> vector<2x4x8x8xf32>
    %c0_8 = arith.constant 0 : index
    %c0_9 = arith.constant 0 : index
    %21 = vector.load %arg4[%c0_8, %c0_9] : memref<8x8xf32, #tpu.memory_space<vmem>>, vector<8x8xf32>
    %22 = vector.shape_cast %21 : vector<8x8xf32> to vector<1x1x8x8xf32>
    %23 = vector.broadcast %22 : vector<1x1x8x8xf32> to vector<2x4x8x8xf32>
    %24 = arith.mulf %20, %23 : vector<2x4x8x8xf32>
    %25 = vector.shape_cast %24 : vector<2x4x8x8xf32> to vector<4x16x8xf32>
    %26 = vector.shape_cast %17 : vector<16x16xf32> to vector<2x8x2x8xf32>
    %27 = tpu.transpose %26, [0, 2, 1, 3] : vector<2x8x2x8xf32> -> vector<2x2x8x8xf32>
    %c0_10 = arith.constant 0 : index
    %c0_11 = arith.constant 0 : index
    %28 = vector.load %arg5[%c0_10, %c0_11] : memref<8x8xf32, #tpu.memory_space<vmem>>, vector<8x8xf32>
    %29 = vector.shape_cast %28 : vector<8x8xf32> to vector<1x1x8x8xf32>
    %30 = vector.broadcast %29 : vector<1x1x8x8xf32> to vector<2x2x8x8xf32>
    %31 = arith.mulf %27, %30 : vector<2x2x8x8xf32>
    %32 = vector.shape_cast %31 : vector<2x2x8x8xf32> to vector<4x8x8xf32>
    %33 = vector.shape_cast %18 : vector<16x16xf32> to vector<2x8x2x8xf32>
    %34 = tpu.transpose %33, [0, 2, 1, 3] : vector<2x8x2x8xf32> -> vector<2x2x8x8xf32>
    %35 = vector.shape_cast %34 : vector<2x2x8x8xf32> to vector<4x8x8xf32>
    "tpu.trace_start"() <{level = 10 : i32, message = "gqa,gka->gqk"}> : () -> ()
    %cst_12 = arith.constant dense<0.000000e+00> : vector<4x16x8xf32>
    %36 = tpu.matmul %25, %32, %cst_12 {dimension_numbers = #tpu.dot_dimension_numbers<[2], [2], [1], [1], [0, 0, 0, 1, 1, 1], [0], [0]>} : vector<4x16x8xf32>, vector<4x8x8xf32>, vector<4x16x8xf32> -> vector<4x16x8xf32>
    "tpu.trace_stop"() : () -> ()
    %c0_13 = arith.constant 0 : index
    %c0_14 = arith.constant 0 : index
    %37 = vector.load %arg6[%c0_13, %c0_14] : memref<16x8xf32, #tpu.memory_space<vmem>>, vector<16x8xf32>
    %38 = vector.shape_cast %37 : vector<16x8xf32> to vector<1x16x8xf32>
    %39 = vector.broadcast %38 : vector<1x16x8xf32> to vector<4x16x8xf32>
    %40 = arith.addf %36, %39 : vector<4x16x8xf32>
    %cst_15 = arith.constant dense<0xFF800000> : vector<4x16xf32>
    %41 = vector.multi_reduction <maximumf>, %40, %cst_15 [2] : vector<4x16x8xf32> to vector<4x16xf32>
    %42 = vector.shape_cast %41 : vector<4x16xf32> to vector<4x16x1xf32>
    %43 = vector.broadcast %42 : vector<4x16x1xf32> to vector<4x16x8xf32>
    %44 = arith.subf %40, %43 : vector<4x16x8xf32>
    %45 = math.exp %44 : vector<4x16x8xf32>
    %cst_16 = arith.constant dense<0.000000e+00> : vector<4x16xf32>
    %46 = vector.multi_reduction <add>, %45, %cst_16 [2] : vector<4x16x8xf32> to vector<4x16xf32>
    %47 = vector.shape_cast %46 : vector<4x16xf32> to vector<4x16x1xf32>
    %48 = tpu.reciprocal %47 : vector<4x16x1xf32> -> vector<4x16x1xf32>
    %49 = vector.broadcast %48 : vector<4x16x1xf32> to vector<4x16x8xf32>
    %50 = arith.mulf %45, %49 : vector<4x16x8xf32>
    "tpu.trace_start"() <{level = 10 : i32, message = "gqk,gka->gqa"}> : () -> ()
    %cst_17 = arith.constant dense<0.000000e+00> : vector<4x16x8xf32>
    %51 = tpu.matmul %50, %35, %cst_17 {dimension_numbers = #tpu.dot_dimension_numbers<[2], [1], [1], [2], [0, 0, 0, 1, 1, 2], [0], [0]>} : vector<4x16x8xf32>, vector<4x8x8xf32>, vector<4x16x8xf32> -> vector<4x16x8xf32>
    "tpu.trace_stop"() : () -> ()
    %52 = vector.shape_cast %51 : vector<4x16x8xf32> to vector<2x4x8x8xf32>
    %53 = tpu.transpose %52, [0, 2, 1, 3] : vector<2x4x8x8xf32> -> vector<2x8x4x8xf32>
    %54 = vector.shape_cast %53 : vector<2x8x4x8xf32> to vector<16x32xf32>
    %c0_18 = arith.constant 0 : index
    %c0_19 = arith.constant 0 : index
    %55 = vector.load %arg2[%c0_18, %c0_19] : memref<32x32xf32, #tpu.memory_space<vmem>>, vector<32x32xf32>
    %cst_20 = arith.constant dense<0.000000e+00> : vector<16x32xf32>
    %56 = tpu.matmul %54, %55, %cst_20 {dimension_numbers = #tpu.dot_dimension_numbers<[1], [0], [0], [1], [0, 0, 1, 1], [], []>} : vector<16x32xf32>, vector<32x32xf32>, vector<16x32xf32> -> vector<16x32xf32>
    %57 = arith.addf %0, %56 : vector<16x32xf32>
    %58 = vector.extract_strided_slice %15 {offsets = [0, 32], sizes = [16, 32], strides = [1, 1]} : vector<16x64xf32> to vector<16x32xf32>
    %59 = tpu.concatenate %57, %58 in 1 : vector<16x32xf32>, vector<16x32xf32> -> vector<16x64xf32>
    %c0_21 = arith.constant 0 : index
    %c0_22 = arith.constant 0 : index
    %60 = vector.load %arg7[%c0_21, %c0_22] : memref<16x64xf32, #tpu.memory_space<vmem>>, vector<16x64xf32>
    tpu.vector_store %arg7[%c0_21, %c0_22], %59 {strides = array<i32>} : memref<16x64xf32, #tpu.memory_space<vmem>>, vector<16x64xf32>,
    return
  }
}

</mosaic_0001>

<bundles_post_ra>
// kernel: tpu_custom_call.1
= control target key start
LH: loop header
LB: loop body
LE: loop exit
PB: predicated region body
PF: predicated region fallthrough
CT: control target
= control target key end

     0   :  { %12 = vsyncpa [#allocation3], 0  ;;  %s2835_s0 = inlined_call_operand.vmem [shape: f32[16,32], index: 0, kind: input, shape index: {}]   ;;  %s2836_s1 = inlined_call_operand.hbm [shape: f32[32,64], index: 1, kind: input, shape index: {}]   ;;  %s2837_s2 = inlined_call_operand.hbm [shape: f32[32,32], index: 2, kind: input, shape index: {}]   ;;  %s2838_s3 = inlined_call_operand.vmem [shape: f32[1,32], index: 3, kind: input, shape index: {}]   ;;  %s2839_s4 = inlined_call_operand.vmem [shape: f32[8,8], index: 4, kind: input, shape index: {}]   ;;  %s2840_s5 = inlined_call_operand.vmem [shape: f32[8,8], index: 5, kind: input, shape index: {}]   ;;  %s2841_s6 = inlined_call_operand.vmem [shape: f32[16,8], index: 6, kind: input, shape index: {}]   ;;  %s2842_s7 = inlined_call_operand.hbm [shape: f32[16,64], index: 7, kind: output, shape index: {}]  }
   0x1   :  { %13 = vsyncpa [#allocation6], 0 }
   0x2   :  { %14 = vsyncpa [#allocation4], 0  ;;  %s2408_s24 = smov [#allocation2]   ;;  %s2336_s28 = scalar_lea.hbm %s2836_s1, 512 }
   0x3   :  { %s22_s25 = sshll.u32 %s2408_s24, 4  ;;  %p2337_p0 = scmp.ne.s32.totalorder %s2836_s1, %s2336_s28  ;;  %s23_s25 = int_to_ptr.vmem [resolvable:$true] %s22_s25 }
   0x4   :  { %p2340_p1 = scmp.lt.u32.totalorder %s2336_s28, %s2836_s1 }
   0x6   :  { %p2342_p2 = pnand %p2340_p1, %p2337_p0 }
   0x8   :  { %2345 = shalt.err (!%p2342_p2)
}
   0x9   :  { %s2346_s10 = scalar_lea.vmem %s23_s25, 512  ;;  %p2351_p4 = scmp.lt.s32.totalorder %s23_s25, %s23_s25 }
   0xa   :  { %p2347_p3 = scmp.ne.s32.totalorder %s23_s25, %s2346_s10  ;;  %p2352_p5 = scmp.lt.s32.totalorder %s2346_s10, %s2346_s10 }
   0xc   :  { %p2353_p6 = por %p2352_p5, %p2351_p4 }
   0xe   :  { %p2354_p7 = pnand %p2353_p6, %p2347_p3 }
  0x10   :  { %2357 = shalt.err (!%p2354_p7)
}
  0x11   :  { %s2409_s11 = smov 128   ;;  %s2410_s12 = smov 8  }
  0x12   :  { %28 = dma.hbm_to_vmem [thread:$0]  %s2836_s1, 512, %s23_s25, [#allocation3], %s2409_s11, %s2409_s11, %s2410_s12  }
  0x13   :  { %s2411_s15 = smov [#allocation5]   ;;  %s2358_s19 = scalar_lea.hbm %s2837_s2, 512 }
  0x14   :  { %s34_s16 = sshll.u32 %s2411_s15, 4  ;;  %p2359_p8 = scmp.ne.s32.totalorder %s2837_s2, %s2358_s19  ;;  %s35_s16 = int_to_ptr.vmem [resolvable:$true] %s34_s16 }
  0x15   :  { %p2362_p9 = scmp.lt.u32.totalorder %s2358_s19, %s2837_s2 }
  0x17   :  { %p2364_p10 = pnand %p2362_p9, %p2359_p8 }
  0x19   :  { %2367 = shalt.err (!%p2364_p10)
}
  0x1a   :  { %s2368_s24 = scalar_lea.vmem %s35_s16, 512  ;;  %p2373_p12 = scmp.lt.s32.totalorder %s35_s16, %s35_s16 }
  0x1b   :  { %p2369_p11 = scmp.ne.s32.totalorder %s35_s16, %s2368_s24  ;;  %p2374_p13 = scmp.lt.s32.totalorder %s2368_s24, %s2368_s24 }
  0x1d   :  { %p2375_p0 = por %p2374_p13, %p2373_p12 }
  0x1f   :  { %p2376_p1 = pnand %p2375_p0, %p2369_p11 }
  0x21   :  { %2379 = shalt.err (!%p2376_p1)
}
  0x22   :  { %40 = dma.hbm_to_vmem [thread:$0]  %s2837_s2, 512, %s35_s16, [#allocation6], %s2409_s11, %s2409_s11, %s2410_s12  }
  0x23   :  { %2402 = dma.done.wait [#allocation3], 512  }
  0x24   :  { %2403 = vsyncadd [#allocation3], 4294966784 }
  0x25   :  { %2404 = dma.done.wait [#allocation6], 512  }
  0x26   :  { %2405 = vsyncadd [#allocation6], 4294966784  ;;  %v55_v0 = vld [vmem:[%s2835_s0] sm:$0xff]  ;;  %vm59_vm0 = vcmask 261120   ;;  %v56_v1 = vld [vmem:[%s2835_s0 + $0x8] sm:$0xff]  ;;  %s2412_s8 = smov 96   ;;  %v194_v31 = vlaneseq }
  0x27   :  { %v57_v2 = vmul.f32 %v55_v0, %v55_v0  ;;  %v58_v3 = vmul.f32 %v56_v1, %v56_v1  ;;  %v84_v6 = vld [vmem:[#allocation2] sm:$0xff]  ;;  %v85_v7 = vld [vmem:[#allocation2 + $0x8] sm:$0xff]  ;;  %v86_v8 = vld [vmem:[#allocation2 + $0x10] sm:$0xff]  ;;  %s2413_s9 = smov 120   ;;  %s2415_s10 = smov 112   ;;  %vm965_vm1 = vcmask 64512  }
  0x28   :  { %v2267_v9 = vpack.c.bf16 %v85_v7, %v84_v6  ;;  %v87_v10 = vld [vmem:[#allocation2 + $0x18] sm:$0xff]  ;;  %v2128_v19 = vld [vmem:[%s2838_s3] ss:$0 sm:$0xff]  ;;  %s2414_s3 = smov 104   ;;  %v2416_v29 = vmov 1983009808  }
  0x29   :  { %v60_v4 = vsel %vm59_vm0, %v57_v2, 0.0  ;;  %v63_v5 = vsel %vm59_vm0, %v58_v3, 0.0  ;;  %v2271_v11 = vpack.c.bf16 %v87_v10, %v86_v8  ;;  %v192_v30 = vunpack.c.l.s4 %v2416_v29  ;;  %s2420_s19 = smov 16   ;;  %s2421_s20 = smov 24  }
  0x2a   :  { %61 = vadd.xlane.f32.xlu0 %v60_v4  ;;  %2268 = vmatprep.subr.bf16.mxu0 %v2267_v9  ;;  %v2417_v32 = vmov 1934713408   ;;  %v195_v36 = vshrl.u32 %v194_v31, 7  ;;  %vm2012_vm2 = vcmask 130048   ;;  %vm2015_vm3 = vcmask 195584   ;;  %s2422_s21 = smov [#allocation7]  }
  0x2b   :  { %2270 = vmatpush3.bf16.msra.mxu0 %v2267_v9  ;;  %v224_v33 = vunpack.c.l.s4 %v2417_v32  ;;  %v193_v35 = vunpack.c.0.s8 %v192_v30  ;;  %v2559_v9 = vld [vmem:[%s2839_s4] sm:$0xff]  ;;  %s2115_s22 = sshll.u32 %s2422_s21, 4  ;;  %vm2107_vm4 = vcmask 523264   ;;  %s2116_s22 = int_to_ptr.vmem [resolvable:$true] %s2115_s22 }
  0x2c   :  { %2272 = vmatprep.subr.bf16.mxu0 %v2271_v11  ;;  %s2380_s26 = scalar_lea.vmem %s2116_s22, 256  ;;  %p2385_p3 = scmp.lt.s32.totalorder %s2116_s22, %s2116_s22 }
  0x2d   :  { %v225_v37 = vunpack.c.0.s8 %v224_v33  ;;  %v2525_v41 = vsub.s32 %v193_v35, %v195_v36  ;;  %p2381_p2 = scmp.ne.s32.totalorder %s2116_s22, %s2380_s26  ;;  %p2386_p4 = scmp.lt.s32.totalorder %s2380_s26, %s2380_s26 }
  0x2e   :  { %64 = vadd.xlane.f32.xlu0 %v63_v5 }
  0x2f   :  { %2274 = vmatpush3.bf16.msra.mxu0 %v2271_v11  ;;  %v2530_v44 = vsub.s32 %v225_v37, %v195_v36  ;;  %p2387_p5 = por %p2386_p4, %p2385_p3 }
  0x31   :  { %p2388_p6 = pnand %p2387_p5, %p2381_p2 }
  0xb7   :  { %v62_v12 = vpop.xlane.xlu0 %61 }
  0xb8   :  { %v67_v13 = vmul.f32 0.03125, %v62_v12 }
  0xba   :  { %v69_v14 = vadd.f32 1.1920929e-07, %v67_v13 }
  0xbb   :  { %v65_v15 = vpop.xlane.xlu0 %64 }
  0xbc   :  { %2298 = vrsqrt.f32 %v69_v14  ;;  %v68_v16 = vmul.f32 0.03125, %v65_v15 }
  0xbe   :  { %v70_v17 = vadd.f32 1.1920929e-07, %v68_v16  ;;  %v2418_v16 = vmov 0.0  }
  0xc0   :  { %2300 = vrsqrt.f32 %v70_v17 }
  0xc6   :  { %v2299_v18 = vpop.eup %2298 }
  0xc7   :  { %v73_v20 = vmul.f32 %v2299_v18, %v55_v0 }
  0xc9   :  { %v82_v21 = vmul.f32 %v2128_v19, %v73_v20 }
  0xca   :  { %v2301_v22 = vpop.eup %2300 }
  0xcb   :  { %v74_v23 = vmul.f32 %v2301_v22, %v56_v1  ;;  %2213 = vmatprep.mubr.msk.f32.mxu0 %vm59_vm0, %v82_v21 }
  0xcd   :  { %v83_v24 = vmul.f32 %v2128_v19, %v74_v23 }
  0xcf   :  { %2214 = vmatmul.mubr.msk.f32.vlgmr.msra.gmra.mrb[0].mxu0 %vm59_vm0, %v83_v24 }
 0x1a2   :  { %v2506_v25 = vpop.f32.mrb[0].mxu0 }
 0x1a3   :  { %v2508_v26 = vpop.f32.mrb[1].mxu0 }
 0x1a4   :  { %470 = vrot.lane.b32.xlu0 %v2508_v26, %s2412_s8  ;;  %171 = vrot.lane.b32.xlu1 %v2508_v26, %s2413_s9 }
 0x1a8   :  { %185 = vrot.lane.b32.xlu0 %v2506_v25, %s2414_s3  ;;  %173 = vrot.lane.b32.xlu1 %v2506_v25, %s2413_s9 }
 0x1ac   :  { %177 = vrot.lane.b32.xlu1 %v2508_v26, %s2415_s10 }
 0x1b0   :  { %183 = vrot.lane.b32.xlu1 %v2508_v26, %s2414_s3 }
 0x216   :  { %v2516_v27 = vpop.permute.xlu1 %171  ;;  %v471_v15 = vpop.permute.xlu0 %470 }
 0x217   :  { %474 = vrot.lane.b32.xlu1 %v2516_v27, %s2412_s8  ;;  %v482_v17 = vcombine.high %v471_v15, %v2418_v16  ;;  %v489_v19 = vrot.slane %v471_v15, %v2525_v41 }
 0x219   :  { %v496_v22 = vrot.slane %v482_v17, %v2525_v41 }
 0x21a   :  { %v2519_v28 = vpop.permute.xlu1 %173  ;;  %v186_v31 = vpop.permute.xlu0 %185 }
 0x21b   :  { %472 = vrot.lane.b32.xlu1 %v2506_v25, %s2412_s8 }
 0x21e   :  { %v178_v34 = vpop.permute.xlu1 %177 }
 0x21f   :  { %476 = vrot.lane.b32.xlu1 %v2519_v28, %s2412_s8  ;;  %v189_v38 = vcombine.low %v2508_v26, %v178_v34  ;;  %v190_v39 = vcombine.high %v2508_v26, %v178_v34 }
 0x221   :  { %v197_v45 = vrot.slane %v189_v38, %v2525_v41  ;;  %v204_v46 = vrot.slane %v190_v39, %v2525_v41 }
 0x222   :  { %v184_v40 = vpop.permute.xlu1 %183 }
 0x223   :  { %v205_v42 = vcombine.low %v2516_v27, %v184_v40  ;;  %v206_v43 = vcombine.high %v2516_v27, %v184_v40  ;;  %179 = vrot.lane.b32.xlu1 %v2506_v25, %s2415_s10 }
 0x225   :  { %v213_v47 = vrot.slane %v205_v42, %v2525_v41  ;;  %v220_v48 = vrot.slane %v206_v43, %v2525_v41  ;;  %v273_v42 = vcombine.low %v2519_v28, %v186_v31 }
 0x227   :  { %v221_v49 = vcombine.low %v197_v45, %v213_v47  ;;  %v222_v50 = vcombine.high %v197_v45, %v213_v47  ;;  %v237_v51 = vcombine.low %v204_v46, %v220_v48  ;;  %v238_v52 = vcombine.high %v204_v46, %v220_v48 }
 0x229   :  { %v229_v53 = vrot.slane %v221_v49, %v2530_v44  ;;  %v236_v54 = vrot.slane %v222_v50, %v2530_v44  ;;  %v245_v55 = vrot.slane %v237_v51, %v2530_v44  ;;  %v252_v56 = vrot.slane %v238_v52, %v2530_v44 }
 0x22a   :  { %v274_v50 = vcombine.high %v2519_v28, %v186_v31 }
 0x22b   :  { %v325_v57 = vcombine.low %v229_v53, %v236_v54  ;;  %v2131_v58 = vcombine.high %v229_v53, %v236_v54  ;;  %v341_v59 = vcombine.low %v245_v55, %v252_v56  ;;  %v2132_v60 = vcombine.high %v245_v55, %v252_v56 }
 0x22d   :  { %v332_v61 = vrot.slane %v325_v57, %v2525_v41  ;;  %v340_v62 = vrot.slane %v2131_v58, %v2525_v41  ;;  %v348_v63 = vrot.slane %v341_v59, %v2525_v41  ;;  %v356_v0 = vrot.slane %v2132_v60, %v2525_v41 }
 0x22e   :  { %v281_v58 = vrot.slane %v273_v42, %v2525_v41 }
 0x22f   :  { %v357_v1 = vcombine.low %v332_v61, %v340_v62  ;;  %v358_v2 = vcombine.high %v332_v61, %v340_v62  ;;  %v373_v3 = vcombine.low %v348_v63, %v356_v0  ;;  %v374_v4 = vcombine.high %v348_v63, %v356_v0 }
 0x231   :  { %v2545_v5 = vrot.slane %v357_v1, %v2530_v44  ;;  %v2548_v6 = vrot.slane %v373_v3, %v2530_v44  ;;  %v2551_v7 = vrot.slane %v358_v2, %v2530_v44  ;;  %v2554_v8 = vrot.slane %v374_v4, %v2530_v44 }
 0x232   :  { %v288_v2 = vrot.slane %v274_v50, %v2525_v41 }
 0x233   :  { %v389_v10 = vcombine.low %v2545_v5, %v2548_v6  ;;  %v390_v11 = vcombine.high %v2545_v5, %v2548_v6  ;;  %v391_v12 = vcombine.low %v2551_v7, %v2554_v8  ;;  %v392_v13 = vcombine.high %v2551_v7, %v2554_v8 }
 0x235   :  { %v462_v14 = vmul.f32 %v2559_v9, %v389_v10 }
 0x237   :  { %2218 = vmatprep.mubr.msk.f32.mxu1 %vm965_vm1, %v462_v14 }
 0x289   :  { %v475_v18 = vpop.permute.xlu1 %474 }
 0x28a   :  { %v497_v20 = vcombine.high %v475_v18, %v2418_v16  ;;  %v504_v21 = vrot.slane %v475_v18, %v2525_v41 }
 0x28c   :  { %v511_v23 = vrot.slane %v497_v20, %v2525_v41  ;;  %v512_v24 = vcombine.low %v489_v19, %v504_v21  ;;  %v513_v29 = vcombine.high %v489_v19, %v504_v21 }
 0x28d   :  { %v473_v30 = vpop.permute.xlu1 %472 }
 0x28e   :  { %v520_v32 = vrot.slane %v512_v24, %v2530_v44  ;;  %v527_v33 = vrot.slane %v513_v29, %v2530_v44  ;;  %v528_v34 = vcombine.low %v496_v22, %v511_v23  ;;  %v529_v35 = vcombine.high %v496_v22, %v511_v23 }
 0x28f   :  { %v548_v36 = vcombine.high %v473_v30, %v2418_v16  ;;  %v555_v43 = vrot.slane %v473_v30, %v2525_v41 }
 0x290   :  { %v536_v37 = vrot.slane %v528_v34, %v2530_v44  ;;  %v543_v38 = vrot.slane %v529_v35, %v2530_v44  ;;  %v614_v39 = vcombine.low %v520_v32, %v527_v33  ;;  %v2135_v40 = vcombine.high %v520_v32, %v527_v33  ;;  %v714_v35 = vld [vmem:[%s2840_s5] sm:$0xff] }
 0x291   :  { %v477_v45 = vpop.permute.xlu1 %476  ;;  %v562_v51 = vrot.slane %v548_v36, %v2525_v41 }
 0x292   :  { %v630_v46 = vcombine.low %v536_v37, %v543_v38  ;;  %v2136_v47 = vcombine.high %v536_v37, %v543_v38  ;;  %v563_v48 = vcombine.high %v477_v45, %v2418_v16  ;;  %v570_v49 = vrot.slane %v477_v45, %v2525_v41 }
 0x293   :  { %v621_v52 = vrot.slane %v614_v39, %v2525_v41  ;;  %v629_v53 = vrot.slane %v2135_v40, %v2525_v41 }
 0x294   :  { %v577_v54 = vrot.slane %v563_v48, %v2525_v41  ;;  %v578_v55 = vcombine.low %v555_v43, %v570_v49  ;;  %v579_v56 = vcombine.high %v555_v43, %v570_v49  ;;  %v637_v57 = vrot.slane %v630_v46, %v2525_v41 }
 0x295   :  { %v180_v59 = vpop.permute.xlu1 %179  ;;  %v645_v60 = vrot.slane %v2136_v47, %v2525_v41  ;;  %v646_v61 = vcombine.low %v621_v52, %v629_v53 }
 0x296   :  { %v586_v62 = vrot.slane %v578_v55, %v2530_v44  ;;  %v593_v63 = vrot.slane %v579_v56, %v2530_v44  ;;  %v594_v0 = vcombine.low %v562_v51, %v577_v54  ;;  %v595_v1 = vcombine.high %v562_v51, %v577_v54 }
 0x297   :  { %v257_v3 = vcombine.low %v2506_v25, %v180_v59  ;;  %v258_v4 = vcombine.high %v2506_v25, %v180_v59  ;;  %v654_v10 = vcombine.low %v637_v57, %v645_v60  ;;  %v653_v21 = vrot.slane %v646_v61, %v2530_v44 }
 0x298   :  { %v602_v14 = vrot.slane %v594_v0, %v2530_v44  ;;  %v609_v15 = vrot.slane %v595_v1, %v2530_v44  ;;  %v664_v17 = vcombine.low %v586_v62, %v593_v63  ;;  %v2137_v18 = vcombine.high %v586_v62, %v593_v63 }
 0x299   :  { %v265_v19 = vrot.slane %v257_v3, %v2525_v41  ;;  %v272_v20 = vrot.slane %v258_v4, %v2525_v41  ;;  %v661_v22 = vrot.slane %v654_v10, %v2530_v44  ;;  %v463_v60 = vmul.f32 %v2559_v9, %v390_v11 }
 0x29a   :  { %v671_v23 = vrot.slane %v664_v17, %v2525_v41  ;;  %v679_v24 = vrot.slane %v2137_v18, %v2525_v41  ;;  %v680_v29 = vcombine.low %v602_v14, %v609_v15  ;;  %v2138_v30 = vcombine.high %v602_v14, %v609_v15 }
 0x29b   :  { %v289_v31 = vcombine.low %v265_v19, %v281_v58  ;;  %v290_v32 = vcombine.high %v265_v19, %v281_v58  ;;  %v305_v33 = vcombine.low %v272_v20, %v288_v2  ;;  %v306_v34 = vcombine.high %v272_v20, %v288_v2 }
 0x29c   :  { %v687_v36 = vrot.slane %v680_v29, %v2525_v41  ;;  %v695_v37 = vrot.slane %v2138_v30, %v2525_v41  ;;  %v696_v38 = vcombine.low %v671_v23, %v679_v24  ;;  %v662_v39 = vcombine.low %v653_v21, %v661_v22 }
 0x29d   :  { %v297_v40 = vrot.slane %v289_v31, %v2530_v44  ;;  %v304_v42 = vrot.slane %v290_v32, %v2530_v44  ;;  %v313_v43 = vrot.slane %v305_v33, %v2530_v44  ;;  %v320_v45 = vrot.slane %v306_v34, %v2530_v44 }
 0x29e   :  { %v663_v46 = vcombine.high %v653_v21, %v661_v22  ;;  %v715_v47 = vmul.f32 %v714_v35, %v662_v39  ;;  %v704_v48 = vcombine.low %v687_v36, %v695_v37  ;;  %v703_v54 = vrot.slane %v696_v38, %v2530_v44  ;;  %v964_v21 = vld [vmem:[%s2841_s6 + $0x8] sm:$0xff]  ;;  %v963_v22 = vld [vmem:[%s2841_s6] sm:$0xff]  ;;  %s2419_s6 = smov 80  }
 0x29f   :  { %v393_v49 = vcombine.low %v297_v40, %v304_v42  ;;  %v2133_v50 = vcombine.high %v297_v40, %v304_v42  ;;  %v409_v51 = vcombine.low %v313_v43, %v320_v45  ;;  %v2134_v52 = vcombine.high %v313_v43, %v320_v45 }
 0x2a0   :  { %2216 = vmatprep.subr.msk.mxu1 %vm965_vm1, %v715_v47  ;;  %v716_v53 = vmul.f32 %v714_v35, %v663_v46  ;;  %v711_v55 = vrot.slane %v704_v48, %v2530_v44  ;;  %v464_v61 = vmul.f32 %v2559_v9, %v391_v12  ;;  %v465_v12 = vmul.f32 %v2559_v9, %v392_v13 }
 0x2a1   :  { %v400_v56 = vrot.slane %v393_v49, %v2525_v41  ;;  %v408_v57 = vrot.slane %v2133_v50, %v2525_v41  ;;  %v416_v58 = vrot.slane %v409_v51, %v2525_v41  ;;  %v424_v59 = vrot.slane %v2134_v52, %v2525_v41  ;;  %2217 = vmatpush3.xpose.msk.msra.mxu1 %vm965_vm1, %v715_v47 }
 0x2a2   :  { %2221 = vmatprep.subr.msk.mxu1 %vm965_vm1, %v716_v53  ;;  %v712_v62 = vcombine.low %v703_v54, %v711_v55  ;;  %v713_v4 = vcombine.high %v703_v54, %v711_v55 }
 0x2a3   :  { %v425_v63 = vcombine.low %v400_v56, %v408_v57  ;;  %v441_v0 = vcombine.low %v416_v58, %v424_v59  ;;  %v426_v1 = vcombine.high %v400_v56, %v408_v57  ;;  %v442_v2 = vcombine.high %v416_v58, %v424_v59 }
 0x2a4   :  { %2219 = vmatmul.mubr.msk.f32.vlgmr.msra.gmra.mrb[0].mxu1 %vm965_vm1, %v463_v60  ;;  %v717_v3 = vmul.f32 %v714_v35, %v712_v62  ;;  %v718_v17 = vmul.f32 %v714_v35, %v713_v4 }
 0x2a5   :  { %2222 = vmatpush3.xpose.msk.msra.mxu1 %vm965_vm1, %v716_v53  ;;  %2223 = vmatprep.mubr.msk.f32.mxu1 %vm965_vm1, %v464_v61  ;;  %v433_v5 = vrot.slane %v425_v63, %v2530_v44  ;;  %v449_v6 = vrot.slane %v441_v0, %v2530_v44  ;;  %v440_v11 = vrot.slane %v426_v1, %v2530_v44 }
 0x2a6   :  { %2226 = vmatprep.subr.msk.mxu1 %vm965_vm1, %v717_v3  ;;  %v456_v10 = vrot.slane %v442_v2, %v2530_v44 }
 0x2a7   :  { %v457_v14 = vcombine.low %v433_v5, %v449_v6  ;;  %v458_v15 = vcombine.high %v433_v5, %v449_v6 }
 0x2a8   :  { %2224 = vmatmul.mubr.msk.f32.vlgmr.msra.gmra.mrb[2].mxu1 %vm965_vm1, %v465_v12  ;;  %v459_v18 = vcombine.low %v440_v11, %v456_v10  ;;  %v460_v7 = vcombine.high %v440_v11, %v456_v10 }
 0x2a9   :  { %2227 = vmatpush3.xpose.msk.msra.mxu1 %vm965_vm1, %v717_v3  ;;  %v466_v19 = vmul.f32 %v2559_v9, %v457_v14  ;;  %v467_v20 = vmul.f32 %v2559_v9, %v458_v15 }
 0x2aa   :  { %2231 = vmatprep.subr.msk.mxu1 %vm965_vm1, %v718_v17  ;;  %v468_v8 = vmul.f32 %v2559_v9, %v459_v18  ;;  %v469_v13 = vmul.f32 %v2559_v9, %v460_v7 }
 0x2ab   :  { %2228 = vmatprep.mubr.msk.f32.mxu1 %vm965_vm1, %v466_v19 }
 0x2ac   :  { %2229 = vmatmul.mubr.msk.f32.vlgmr.msra.gmra.mrb[4].mxu1 %vm965_vm1, %v467_v20 }
 0x2ad   :  { %2232 = vmatpush3.xpose.msk.msra.mxu1 %vm965_vm1, %v718_v17  ;;  %2233 = vmatprep.mubr.msk.f32.mxu1 %vm965_vm1, %v468_v8 }
 0x2b0   :  { %2234 = vmatmul.mubr.msk.f32.vlgmr.msra.gmra.mrb[6].mxu1 %vm965_vm1, %v469_v13 }
 0x377   :  { %v2220_v23 = vpop.f32.mrb[0].mxu1 }
 0x378   :  { %v1047_v24 = vadd.f32 %v2220_v23, %v964_v21  ;;  %v1041_v29 = vpop.f32.mrb[1].mxu1 }
 0x379   :  { %v1042_v30 = vadd.f32 %v1041_v29, %v963_v22 }
 0x37a   :  { %v1305_v31 = vsel %vm965_vm1, %v1047_v24, -inf }
 0x37b   :  { %1306 = vmax.xlane.f32.xlu0 %v1305_v31  ;;  %v2225_v32 = vpop.f32.mrb[2].mxu1  ;;  %v1302_v9 = vsel %vm965_vm1, %v1042_v30, -inf }
 0x37c   :  { %v1131_v33 = vadd.f32 %v2225_v32, %v964_v21  ;;  %v1125_v34 = vpop.f32.mrb[3].mxu1  ;;  %1303 = vmax.xlane.f32.xlu1 %v1302_v9 }
 0x37d   :  { %v1126_v35 = vadd.f32 %v1125_v34, %v963_v22 }
 0x37e   :  { %v1311_v36 = vsel %vm965_vm1, %v1131_v33, -inf }
 0x37f   :  { %v1308_v37 = vsel %vm965_vm1, %v1126_v35, -inf  ;;  %v2230_v38 = vpop.f32.mrb[4].mxu1 }
 0x380   :  { %1309 = vmax.xlane.f32.xlu0 %v1308_v37  ;;  %1312 = vmax.xlane.f32.xlu1 %v1311_v36  ;;  %v1215_v39 = vadd.f32 %v2230_v38, %v964_v21  ;;  %v1209_v40 = vpop.f32.mrb[5].mxu1 }
 0x381   :  { %v1210_v43 = vadd.f32 %v1209_v40, %v963_v22 }
 0x382   :  { %v1317_v42 = vsel %vm965_vm1, %v1215_v39, -inf }
 0x383   :  { %v2235_v45 = vpop.f32.mrb[6].mxu1  ;;  %v1314_v50 = vsel %vm965_vm1, %v1210_v43, -inf }
 0x384   :  { %1318 = vmax.xlane.f32.xlu0 %v1317_v42  ;;  %v1299_v46 = vadd.f32 %v2235_v45, %v964_v21  ;;  %v1293_v47 = vpop.f32.mrb[7].mxu1 }
 0x385   :  { %v1294_v48 = vadd.f32 %v1293_v47, %v963_v22 }
 0x386   :  { %v1323_v49 = vsel %vm965_vm1, %v1299_v46, -inf }
 0x387   :  { %1324 = vmax.xlane.f32.xlu1 %v1323_v49  ;;  %v1320_v51 = vsel %vm965_vm1, %v1294_v48, -inf }
 0x388   :  { %1315 = vmax.xlane.f32.xlu0 %v1314_v50 }
 0x38b   :  { %1321 = vmax.xlane.f32.xlu1 %v1320_v51 }
 0x39c   :  { %723 = vrot.lane.b32.xlu1 %v2516_v27, %s2419_s6 }
 0x39e   :  { %719 = vrot.lane.b32.xlu0 %v2508_v26, %s2419_s6 }
 0x408   :  { %v1307_v52 = vpop.xlane.xlu0 %1306 }
 0x409   :  { %v1327_v53 = vsub.f32 %v1047_v24, %v1307_v52  ;;  %v1304_v54 = vpop.xlane.xlu1 %1303 }
 0x40a   :  { %v1326_v55 = vsub.f32 %v1042_v30, %v1304_v54 }
 0x40b   :  { %v1336_v56 = vmul.f32 1.442695, %v1327_v53 }
 0x40c   :  { %v1334_v57 = vmul.f32 1.442695, %v1326_v55 }
 0x40d   :  { %2302 = vpow2.f32 %v1336_v56  ;;  %v1310_v58 = vpop.xlane.xlu0 %1309  ;;  %v1313_v59 = vpop.xlane.xlu1 %1312 }
 0x40e   :  { %v1328_v60 = vsub.f32 %v1126_v35, %v1310_v58  ;;  %v1329_v61 = vsub.f32 %v1131_v33, %v1313_v59  ;;  %2304 = vpow2.f32 %v1334_v57 }
 0x410   :  { %v1340_v62 = vmul.f32 1.442695, %v1329_v61  ;;  %v1338_v63 = vmul.f32 1.442695, %v1328_v60 }
 0x411   :  { %v1319_v0 = vpop.xlane.xlu0 %1318 }
 0x412   :  { %v1331_v1 = vsub.f32 %v1215_v39, %v1319_v0  ;;  %2306 = vpow2.f32 %v1340_v62 }
 0x413   :  { %2308 = vpow2.f32 %v1338_v63 }
 0x414   :  { %v1344_v27 = vmul.f32 1.442695, %v1331_v1  ;;  %v1325_v2 = vpop.xlane.xlu1 %1324 }
 0x415   :  { %v1316_v3 = vpop.xlane.xlu0 %1315  ;;  %v1333_v4 = vsub.f32 %v1299_v46, %v1325_v2 }
 0x416   :  { %2310 = vpow2.f32 %v1344_v27  ;;  %v1330_v5 = vsub.f32 %v1210_v43, %v1316_v3 }
 0x417   :  { %v2675_v6 = vpop.eup %2302  ;;  %v1348_v11 = vmul.f32 1.442695, %v1333_v4 }
 0x418   :  { %v1342_v12 = vmul.f32 1.442695, %v1330_v5  ;;  %v1353_v10 = vsel %vm965_vm1, %v2675_v6, 0.0  ;;  %v1322_v14 = vpop.xlane.xlu1 %1321  ;;  %v2679_v15 = vpop.eup %2304 }
 0x419   :  { %2312 = vpow2.f32 %v1348_v11  ;;  %1354 = vadd.xlane.f32.xlu0 %v1353_v10  ;;  %v720_v17 = vpop.permute.xlu0 %719  ;;  %v1332_v18 = vsub.f32 %v1294_v48, %v1322_v14  ;;  %v1350_v7 = vsel %vm965_vm1, %v2679_v15, 0.0 }
 0x41a   :  { %2314 = vpow2.f32 %v1342_v12  ;;  %v731_v19 = vcombine.high %v720_v17, %v2418_v16  ;;  %v738_v21 = vrot.slane %v720_v17, %v2525_v41 }
 0x41b   :  { %v1346_v20 = vmul.f32 1.442695, %v1332_v18 }
 0x41c   :  { %v724_v8 = vpop.permute.xlu1 %723  ;;  %v2684_v13 = vpop.eup %2306  ;;  %v745_v30 = vrot.slane %v731_v19, %v2525_v41 }
 0x41d   :  { %2316 = vpow2.f32 %v1346_v20  ;;  %1351 = vadd.xlane.f32.xlu0 %v1350_v7  ;;  %v746_v22 = vcombine.high %v724_v8, %v2418_v16  ;;  %v753_v23 = vrot.slane %v724_v8, %v2525_v41  ;;  %v1359_v24 = vsel %vm965_vm1, %v2684_v13, 0.0  ;;  %v2691_v29 = vpop.eup %2308 }
 0x41e   :  { %1360 = vadd.xlane.f32.xlu1 %v1359_v24  ;;  %v1356_v39 = vsel %vm965_vm1, %v2691_v29, 0.0 }
 0x41f   :  { %v760_v31 = vrot.slane %v746_v22, %v2525_v41  ;;  %v761_v32 = vcombine.low %v738_v21, %v753_v23  ;;  %v762_v9 = vcombine.high %v738_v21, %v753_v23 }
 0x420   :  { %v2695_v33 = vpop.eup %2310 }
 0x421   :  { %v769_v34 = vrot.slane %v761_v32, %v2530_v44  ;;  %v776_v35 = vrot.slane %v762_v9, %v2530_v44  ;;  %v777_v36 = vcombine.low %v745_v30, %v760_v31  ;;  %v778_v37 = vcombine.high %v745_v30, %v760_v31 }
 0x422   :  { %v1365_v38 = vsel %vm965_vm1, %v2695_v33, 0.0  ;;  %1357 = vadd.xlane.f32.xlu1 %v1356_v39 }
 0x423   :  { %v2703_v40 = vpop.eup %2312  ;;  %v785_v42 = vrot.slane %v777_v36, %v2530_v44  ;;  %v792_v43 = vrot.slane %v778_v37, %v2530_v44  ;;  %v863_v45 = vcombine.low %v769_v34, %v776_v35  ;;  %v2139_v46 = vcombine.high %v769_v34, %v776_v35  ;;  %1366 = vadd.xlane.f32.xlu0 %v1365_v38 }
 0x424   :  { %v2707_v47 = vpop.eup %2314  ;;  %v1371_v48 = vsel %vm965_vm1, %v2703_v40, 0.0 }
 0x425   :  { %v870_v49 = vrot.slane %v863_v45, %v2525_v41  ;;  %v878_v50 = vrot.slane %v2139_v46, %v2525_v41  ;;  %v879_v51 = vcombine.low %v785_v42, %v792_v43  ;;  %v2140_v52 = vcombine.high %v785_v42, %v792_v43 }
 0x426   :  { %v1362_v53 = vsel %vm965_vm1, %v2707_v47, 0.0  ;;  %1372 = vadd.xlane.f32.xlu1 %v1371_v48 }
 0x427   :  { %v2715_v54 = vpop.eup %2316  ;;  %1363 = vadd.xlane.f32.xlu0 %v1362_v53  ;;  %v886_v55 = vrot.slane %v879_v51, %v2525_v41  ;;  %v894_v56 = vrot.slane %v2140_v52, %v2525_v41  ;;  %v895_v57 = vcombine.low %v870_v49, %v878_v50 }
 0x428   :  { %v1368_v58 = vsel %vm965_vm1, %v2715_v54, 0.0 }
 0x429   :  { %v903_v59 = vcombine.low %v886_v55, %v894_v56  ;;  %v902_v60 = vrot.slane %v895_v57, %v2530_v44 }
 0x42a   :  { %1369 = vadd.xlane.f32.xlu1 %v1368_v58 }
 0x42b   :  { %v910_v61 = vrot.slane %v903_v59, %v2530_v44 }
 0x42d   :  { %v911_v62 = vcombine.low %v902_v60, %v910_v61  ;;  %v912_v63 = vcombine.high %v902_v60, %v910_v61 }
 0x42f   :  { %2236 = vmatprep.subr.mxu0 %v911_v62  ;;  %2241 = vmatprep.subr.mxu1 %v912_v63 }
 0x430   :  { %2237 = vmatpush3.msra.mxu0 %v911_v62  ;;  %2242 = vmatpush3.msra.mxu1 %v912_v63 }
 0x43b   :  { %721 = vrot.lane.b32.xlu1 %v2506_v25, %s2419_s6 }
 0x43d   :  { %725 = vrot.lane.b32.xlu0 %v2519_v28, %s2419_s6 }
 0x4a6   :  { %v1355_v0 = vpop.xlane.xlu0 %1354 }
 0x4a7   :  { %2318 = vrcp.f32 %v1355_v0 }
 0x4aa   :  { %v1352_v1 = vpop.xlane.xlu0 %1351 }
 0x4ab   :  { %2320 = vrcp.f32 %v1352_v1  ;;  %v1361_v27 = vpop.xlane.xlu1 %1360 }
 0x4ac   :  { %2322 = vrcp.f32 %v1361_v27 }
 0x4af   :  { %v1358_v3 = vpop.xlane.xlu1 %1357 }
 0x4b0   :  { %v1367_v2 = vpop.xlane.xlu0 %1366  ;;  %2324 = vrcp.f32 %v1358_v3 }
 0x4b1   :  { %v2319_v4 = vpop.eup %2318 }
 0x4b2   :  { %v1383_v14 = vmul.f32 %v2319_v4, %v2675_v6 }
 0x4b3   :  { %v1373_v12 = vpop.xlane.xlu1 %1372 }
 0x4b4   :  { %v1364_v5 = vpop.xlane.xlu0 %1363 }
 0x4b5   :  { %v2321_v11 = vpop.eup %2320  ;;  %2326 = vrcp.f32 %v1364_v5 }
 0x4b6   :  { %v1382_v10 = vmul.f32 %v2321_v11, %v2679_v15  ;;  %v2323_v18 = vpop.eup %2322 }
 0x4b7   :  { %v1370_v28 = vpop.xlane.xlu1 %1369  ;;  %v1385_v21 = vmul.f32 %v2323_v18, %v2684_v13 }
 0x4b8   :  { %v726_v17 = vpop.permute.xlu0 %725  ;;  %2238 = vmatprep.mubr.msk.f32.mxu0 %vm965_vm1, %v1382_v10  ;;  %2328 = vrcp.f32 %v1370_v28 }
 0x4b9   :  { %2239 = vmatmul.mubr.msk.f32.vlgmr.msra.gmra.mrb[2].mxu0 %vm965_vm1, %v1383_v14  ;;  %v812_v19 = vcombine.high %v726_v17, %v2418_v16  ;;  %v819_v15 = vrot.slane %v726_v17, %v2525_v41  ;;  %2330 = vrcp.f32 %v1367_v2 }
 0x4ba   :  { %v2325_v20 = vpop.eup %2324  ;;  %2332 = vrcp.f32 %v1373_v12 }
 0x4bb   :  { %v722_v7 = vpop.permute.xlu1 %721  ;;  %v1384_v8 = vmul.f32 %v2325_v20, %v2691_v29  ;;  %v826_v24 = vrot.slane %v812_v19, %v2525_v41 }
 0x4bc   :  { %v797_v6 = vcombine.high %v722_v7, %v2418_v16  ;;  %v804_v22 = vrot.slane %v722_v7, %v2525_v41 }
 0x4bd   :  { %2243 = vmatprep.mubr.msk.f32.mxu1 %vm965_vm1, %v1384_v8 }
 0x4be   :  { %v811_v30 = vrot.slane %v797_v6, %v2525_v41  ;;  %v827_v31 = vcombine.low %v804_v22, %v819_v15  ;;  %v828_v32 = vcombine.high %v804_v22, %v819_v15  ;;  %2244 = vmatmul.mubr.msk.f32.vlgmr.msra.gmra.mrb[8].mxu1 %vm965_vm1, %v1385_v21 }
 0x4bf   :  { %v2327_v23 = vpop.eup %2326 }
 0x4c0   :  { %v1386_v29 = vmul.f32 %v2327_v23, %v2707_v47  ;;  %v835_v13 = vrot.slane %v827_v31, %v2530_v44  ;;  %v842_v16 = vrot.slane %v828_v32, %v2530_v44  ;;  %v843_v9 = vcombine.low %v811_v30, %v826_v24 }
 0x4c1   :  { %v844_v34 = vcombine.high %v811_v30, %v826_v24 }
 0x4c2   :  { %2248 = vmatprep.mubr.msk.f32.mxu0 %vm965_vm1, %v1386_v29  ;;  %v2329_v35 = vpop.eup %2328  ;;  %v851_v36 = vrot.slane %v843_v9, %v2530_v44  ;;  %v913_v38 = vcombine.low %v835_v13, %v842_v16  ;;  %v2141_v39 = vcombine.high %v835_v13, %v842_v16 }
 0x4c3   :  { %v858_v37 = vrot.slane %v844_v34, %v2530_v44  ;;  %v1388_v42 = vmul.f32 %v2329_v35, %v2715_v54  ;;  %v2331_v52 = vpop.eup %2330 }
 0x4c4   :  { %v920_v43 = vrot.slane %v913_v38, %v2525_v41  ;;  %v928_v45 = vrot.slane %v2141_v39, %v2525_v41  ;;  %v2333_v54 = vpop.eup %2332  ;;  %v1387_v58 = vmul.f32 %v2331_v52, %v2695_v33  ;;  %v2018_v52 = vld [vmem:[#allocation5] sm:$0xff] }
 0x4c5   :  { %v929_v46 = vcombine.low %v851_v36, %v858_v37  ;;  %v2142_v47 = vcombine.high %v851_v36, %v858_v37  ;;  %2253 = vmatprep.mubr.msk.f32.mxu1 %vm965_vm1, %v1388_v42  ;;  %v1389_v59 = vmul.f32 %v2333_v54, %v2703_v40 }
 0x4c6   :  { %v945_v50 = vcombine.low %v920_v43, %v928_v45 }
 0x4c7   :  { %v936_v48 = vrot.slane %v929_v46, %v2525_v41  ;;  %v944_v49 = vrot.slane %v2142_v47, %v2525_v41 }
 0x4c8   :  { %v952_v53 = vrot.slane %v945_v50, %v2530_v44 }
 0x4c9   :  { %v953_v51 = vcombine.low %v936_v48, %v944_v49 }
 0x4cb   :  { %v960_v55 = vrot.slane %v953_v51, %v2530_v44 }
 0x4cd   :  { %v961_v56 = vcombine.low %v952_v53, %v960_v55  ;;  %v962_v57 = vcombine.high %v952_v53, %v960_v55  ;;  %v2019_v53 = vld [vmem:[#allocation5 + $0x8] sm:$0xff] }
 0x4cf   :  { %2246 = vmatprep.subr.mxu0 %v961_v56  ;;  %2251 = vmatprep.subr.mxu1 %v962_v57 }
 0x4d0   :  { %2247 = vmatpush3.msra.mxu0 %v961_v56  ;;  %2252 = vmatpush3.msra.mxu1 %v962_v57 }
 0x4d1   :  { %2249 = vmatmul.mubr.msk.f32.vlgmr.msra.gmra.mrb[4].mxu0 %vm965_vm1, %v1387_v58  ;;  %2254 = vmatmul.mubr.msk.f32.vlgmr.msra.gmra.mrb[10].mxu1 %vm965_vm1, %v1389_v59  ;;  %v2275_v58 = vpack.c.bf16 %v2019_v53, %v2018_v52 }
 0x4d3   :  { %2276 = vmatprep.subr.bf16.mxu0 %v2275_v58 }
 0x4d4   :  { %2278 = vmatpush3.bf16.msra.mxu0 %v2275_v58 }
 0x58c   :  { %v2240_v60 = vpop.f32.mrb[2].mxu0 }
 0x58d   :  { %v1462_v61 = vpop.f32.mrb[3].mxu0 }
 0x591   :  { %v2245_v62 = vpop.f32.mrb[8].mxu1 }
 0x592   :  { %v1730_v63 = vcombine.low %v2240_v60, %v2245_v62  ;;  %v1731_v0 = vcombine.high %v2240_v60, %v2245_v62  ;;  %v1543_v1 = vpop.f32.mrb[9].mxu1 }
 0x593   :  { %v1714_v27 = vcombine.low %v1462_v61, %v1543_v1  ;;  %v1715_v2 = vcombine.high %v1462_v61, %v1543_v1 }
 0x594   :  { %v1738_v33 = vrot.slane %v1730_v63, %v2525_v41  ;;  %v1745_v40 = vrot.slane %v1731_v0, %v2525_v41  ;;  %v2020_v63 = vld [vmem:[#allocation5 + $0x10] sm:$0xff]  ;;  %v2021_v0 = vld [vmem:[#allocation5 + $0x18] sm:$0xff] }
 0x595   :  { %v1722_v3 = vrot.slane %v1714_v27, %v2525_v41  ;;  %v1729_v4 = vrot.slane %v1715_v2, %v2525_v41 }
 0x597   :  { %v1746_v5 = vcombine.low %v1722_v3, %v1738_v33  ;;  %v1747_v11 = vcombine.high %v1722_v3, %v1738_v33  ;;  %v1762_v12 = vcombine.low %v1729_v4, %v1745_v40  ;;  %v1763_v10 = vcombine.high %v1729_v4, %v1745_v40 }
 0x598   :  { %v2279_v40 = vpack.c.bf16 %v2021_v0, %v2020_v63 }
 0x599   :  { %v1754_v14 = vrot.slane %v1746_v5, %v2530_v44  ;;  %v1761_v17 = vrot.slane %v1747_v11, %v2530_v44  ;;  %v1770_v28 = vrot.slane %v1762_v12, %v2530_v44  ;;  %v1777_v18 = vrot.slane %v1763_v10, %v2530_v44 }
 0x59a   :  { %2280 = vmatprep.subr.bf16.mxu0 %v2279_v40 }
 0x59b   :  { %v1850_v19 = vcombine.low %v1754_v14, %v1761_v17  ;;  %v2163_v20 = vcombine.high %v1754_v14, %v1761_v17  ;;  %v1866_v7 = vcombine.low %v1770_v28, %v1777_v18  ;;  %v2164_v8 = vcombine.high %v1770_v28, %v1777_v18  ;;  %2282 = vmatpush3.bf16.msra.mxu0 %v2279_v40 }
 0x59d   :  { %v1857_v21 = vrot.slane %v1850_v19, %v2525_v41  ;;  %v1865_v15 = vrot.slane %v2163_v20, %v2525_v41  ;;  %v1873_v6 = vrot.slane %v1866_v7, %v2525_v41  ;;  %v1881_v22 = vrot.slane %v2164_v8, %v2525_v41 }
 0x59f   :  { %v1882_v23 = vcombine.low %v1857_v21, %v1865_v15  ;;  %v1898_v24 = vcombine.low %v1873_v6, %v1881_v22  ;;  %v1883_v30 = vcombine.high %v1857_v21, %v1865_v15  ;;  %v1899_v31 = vcombine.high %v1873_v6, %v1881_v22 }
 0x5a1   :  { %v2772_v32 = vrot.slane %v1882_v23, %v2530_v44  ;;  %v2775_v29 = vrot.slane %v1898_v24, %v2530_v44  ;;  %v1897_v13 = vrot.slane %v1883_v30, %v2530_v44  ;;  %v1913_v16 = vrot.slane %v1899_v31, %v2530_v44 }
 0x5a3   :  { %v1915_v35 = vcombine.high %v2772_v32, %v2775_v29  ;;  %v1914_v36 = vcombine.low %v2772_v32, %v2775_v29  ;;  %v1916_v37 = vcombine.low %v1897_v13, %v1913_v16  ;;  %v1917_v38 = vcombine.high %v1897_v13, %v1913_v16  ;;  %v2334_v32 = vld [vmem:[%s2835_s0 + $0x8] sm:$0xff] }
 0x5a4   :  { %v2250_v9 = vpop.f32.mrb[4].mxu0  ;;  %v2255_v34 = vpop.f32.mrb[10].mxu1 }
 0x5a5   :  { %v1798_v39 = vcombine.low %v2250_v9, %v2255_v34  ;;  %v1799_v42 = vcombine.high %v2250_v9, %v2255_v34  ;;  %v1624_v43 = vpop.f32.mrb[5].mxu0  ;;  %v1705_v45 = vpop.f32.mrb[11].mxu1  ;;  %1988 = vrot.lane.b32.xlu1 %v1915_v35, %s2410_s12 }
 0x5a6   :  { %v1782_v46 = vcombine.low %v1624_v43, %v1705_v45  ;;  %v1783_v47 = vcombine.high %v1624_v43, %v1705_v45 }
 0x5a7   :  { %v1806_v48 = vrot.slane %v1798_v39, %v2525_v41  ;;  %v1813_v49 = vrot.slane %v1799_v42, %v2525_v41 }
 0x5a8   :  { %v1790_v50 = vrot.slane %v1782_v46, %v2525_v41  ;;  %v1797_v51 = vrot.slane %v1783_v47, %v2525_v41 }
 0x5a9   :  { %1996 = vrot.lane.b32.xlu1 %v1916_v37, %s2420_s19  ;;  %v2335_v37 = vld [vmem:[%s2835_s0] sm:$0xff] }
 0x5aa   :  { %v1814_v55 = vcombine.low %v1790_v50, %v1806_v48  ;;  %v1815_v54 = vcombine.high %v1790_v50, %v1806_v48  ;;  %v1830_v56 = vcombine.low %v1797_v51, %v1813_v49  ;;  %v1831_v57 = vcombine.high %v1797_v51, %v1813_v49 }
 0x5ac   :  { %v1822_v59 = vrot.slane %v1814_v55, %v2530_v44  ;;  %v1829_v60 = vrot.slane %v1815_v54, %v2530_v44  ;;  %v1838_v61 = vrot.slane %v1830_v56, %v2530_v44  ;;  %v1845_v62 = vrot.slane %v1831_v57, %v2530_v44 }
 0x5ad   :  { %2004 = vrot.lane.b32.xlu1 %v1917_v38, %s2421_s20 }
 0x5ae   :  { %v1918_v1 = vcombine.low %v1822_v59, %v1829_v60  ;;  %v2165_v27 = vcombine.high %v1822_v59, %v1829_v60  ;;  %v1934_v2 = vcombine.low %v1838_v61, %v1845_v62  ;;  %v2166_v33 = vcombine.high %v1838_v61, %v1845_v62 }
 0x5b0   :  { %v1925_v3 = vrot.slane %v1918_v1, %v2525_v41  ;;  %v1933_v4 = vrot.slane %v2165_v27, %v2525_v41  ;;  %v1941_v5 = vrot.slane %v1934_v2, %v2525_v41  ;;  %v1949_v11 = vrot.slane %v2166_v33, %v2525_v41 }
 0x5b2   :  { %v1950_v12 = vcombine.low %v1925_v3, %v1933_v4  ;;  %v1966_v10 = vcombine.low %v1941_v5, %v1949_v11  ;;  %v1951_v14 = vcombine.high %v1925_v3, %v1933_v4  ;;  %v1967_v17 = vcombine.high %v1941_v5, %v1949_v11 }
 0x5b4   :  { %v1958_v28 = vrot.slane %v1950_v12, %v2530_v44  ;;  %v1974_v18 = vrot.slane %v1966_v10, %v2530_v44  ;;  %v1965_v19 = vrot.slane %v1951_v14, %v2530_v44  ;;  %v1981_v20 = vrot.slane %v1967_v17, %v2530_v44 }
 0x5b6   :  { %v1983_v7 = vcombine.high %v1958_v28, %v1974_v18  ;;  %v1982_v8 = vcombine.low %v1958_v28, %v1974_v18  ;;  %v1984_v21 = vcombine.low %v1965_v19, %v1981_v20  ;;  %v1985_v15 = vcombine.high %v1965_v19, %v1981_v20 }
 0x5b8   :  { %1990 = vrot.lane.b32.xlu0 %v1983_v7, %s2410_s12 }
 0x5bc   :  { %1998 = vrot.lane.b32.xlu0 %v1984_v21, %s2420_s19 }
 0x5c0   :  { %2006 = vrot.lane.b32.xlu0 %v1985_v15, %s2421_s20 }
 0x617   :  { %v1989_v41 = vpop.permute.xlu1 %1988 }
 0x618   :  { %v2010_v22 = vsel %vm965_vm1, %v1914_v36, %v1989_v41 }
 0x61b   :  { %v1997_v6 = vpop.permute.xlu1 %1996 }
 0x61c   :  { %v2013_v23 = vsel %vm2012_vm2, %v2010_v22, %v1997_v6 }
 0x61f   :  { %v2005_v44 = vpop.permute.xlu1 %2004 }
 0x620   :  { %v2016_v24 = vsel %vm2015_vm3, %v2013_v23, %v2005_v44 }
 0x621   :  { %2264 = vmatprep.mubr.msk.f32.mxu0 %vm59_vm0, %v2016_v24 }
 0x62a   :  { %v1991_v30 = vpop.permute.xlu0 %1990 }
 0x62b   :  { %v2011_v13 = vsel %vm965_vm1, %v1982_v8, %v1991_v30 }
 0x62e   :  { %v1999_v31 = vpop.permute.xlu0 %1998 }
 0x62f   :  { %v2014_v16 = vsel %vm2012_vm2, %v2011_v13, %v1999_v31 }
 0x632   :  { %v2007_v9 = vpop.permute.xlu0 %2006 }
 0x633   :  { %v2017_v34 = vsel %vm2015_vm3, %v2014_v16, %v2007_v9 }
 0x634   :  { %2265 = vmatmul.mubr.msk.f32.vlgmr.msra.gmra.mrb[6].mxu0 %vm59_vm0, %v2017_v34 }
 0x707   :  { %v2266_v35 = vpop.f32.mrb[6].mxu0 }
 0x708   :  { %v2104_v29 = vadd.f32 %v2334_v32, %v2266_v35  ;;  %v2094_v36 = vpop.f32.mrb[7].mxu0 }
 0x709   :  { %v2103_v38 = vadd.f32 %v2335_v37, %v2094_v36 }
 0x70a   :  { %v2106_v39 = vsel %vm59_vm0, %v2104_v29, %v2506_v25 }
 0x70b   :  { %v2105_v42 = vsel %vm59_vm0, %v2103_v38, %v2508_v26  ;;  %2109 = vst.msk [vmem:[#allocation7 + $0x8] sm:$0xff] %vm2107_vm4, %v2106_v39 }
 0x70c   :  { %2108 = vst.msk [vmem:[#allocation7] sm:$0xff] %vm2107_vm4, %v2105_v42 }
 0x70d   :  { %2391 = shalt.err (!%p2388_p6)
}
 0x70e   :  { %s2392_s0 = scalar_lea.hbm %s2842_s7, 256 }
 0x70f   :  { %p2393_p7 = scmp.ne.s32.totalorder %s2842_s7, %s2392_s0  ;;  %p2396_p8 = scmp.lt.u32.totalorder %s2392_s0, %s2842_s7 }
 0x711   :  { %p2398_p9 = pnand %p2396_p8, %p2393_p7 }
 0x713   :  { %2401 = shalt.err (!%p2398_p9)
}
 0x714   :  { %2121 = dma.vmem_to_hbm [thread:$0]  %s2116_s22, 256, %s2842_s7, [#allocation4], %s2409_s11, %s2409_s11, %s2410_s12  }
 0x715   :  { %2406 = dma.done.wait [#allocation4], 256  }
 0x716   :  { %2407 = vsyncadd [#allocation4], 4294967040 }
 0x717   :  { %2125 = vsyncpa [#allocation3], 1 }
 0x718   :  { %2126 = vsyncpa [#allocation6], 1 }
 0x719   :  { %2127 = vsyncpa [#allocation4], 1 }

</bundles_post_ra>
